<compile_context>
chip_gen: v6e
topology: v6e:2x2x1
jax: 0.10.0
libtpu: 0.0.40
codegen_flags: <defaults>
</compile_context>

<pallas_src>
import functools

import jax
import jax.numpy as jnp
import numpy as np
from jax import lax
from jax.experimental import pallas as pl
from jax.experimental.pallas import tpu as pltpu


def _round_up(n, m):
    return ((n + m - 1) // m) * m


def _superposition_kernel(x_ref, wt_ref, w_ref, b_ref, o_ref, *, precision):
    # x_ref: (TB, F), wt_ref: (F, Hp), w_ref: (Hp, F), b_ref: (1, F), o_ref: (TB, F)
    x = x_ref[...]
    # h = x @ W.T  -- canonical (M,K)x(K,N) against the pre-transposed resident copy,
    # so Mosaic never relayouts W through the XLU inside the per-tile body.
    h = jnp.dot(x, wt_ref[...], preferred_element_type=jnp.float32, precision=precision)
    # out = relu(h @ W + b) ; bias broadcast-added once per tile.
    y = jnp.dot(h, w_ref[...], preferred_element_type=jnp.float32, precision=precision)
    y = y + b_ref[...]
    o_ref[...] = jnp.maximum(y, 0.0).astype(o_ref.dtype)


def superposition_forward(
    x, W, b, *,
    block_b=1024,                         # upper bound on batch tile (v6e/v5e like it big)
    vmem_budget_bytes=40 * 1024 * 1024,   # conservative: fits v7x's 64 MiB physical VMEM
    vmem_limit_bytes=48 * 1024 * 1024,    # raise on v5e/v6e (128 MiB VMEM) for bigger tiles
    precision=lax.Precision.HIGHEST,      # fp32-faithful; relax for more MXU throughput
):
    B, F = x.shape
    H, F2 = W.shape
    assert F == F2 and b.shape == (F,)

    # Pad only the tiny weight/bias arrays.  Zero-padded hidden units contribute nothing,
    # so the math is exact; x and the output are never copied or padded.
    Hp = _round_up(H, 128)
    W_pad = jnp.zeros((Hp, F), jnp.float32).at[:H, :].set(W.astype(jnp.float32))
    WT_pad = jnp.transpose(W_pad)                       # (F, Hp) resident copy for matmul 1
    b_row = b.astype(jnp.float32).reshape(1, F)

    # Batch tile from an explicit VMEM budget:
    #   resident: W + W.T + b ; per batch row: double-buffered x & out tiles + h scratch.
    resident_bytes = (2 * Hp * F + F) * 4
    bytes_per_batch_row = (4 * F + Hp) * 4
    fit_rows = max(8, (vmem_budget_bytes - resident_bytes) // bytes_per_batch_row)
    if B <= 8:
        TB = B                                           # full-dim block (always legal)
    else:
        TB = max(8, min(block_b, _round_up(B, 8), (fit_rows // 8) * 8))
    grid_b = pl.cdiv(B, TB)
    # TODO(synk): for very large Hp*F on v7x (W no longer comfortably VMEM-resident in
    # 64 MiB), add an F-tiling grid axis with a VMEM f32 accumulator instead of keeping
    # the whole (Hp, F) W resident.

    kernel = functools.partial(_superposition_kernel, precision=precision)

    return pl.pallas_call(
        kernel,
        out_shape=jax.ShapeDtypeStruct((B, F), x.dtype),
        grid=(grid_b,),
        in_specs=[
            pl.BlockSpec((TB, F), lambda i: (i, 0)),     # x: one batch tile per step
            pl.BlockSpec((F, Hp), lambda i: (0, 0)),     # W.T: resident across batch tiles
            pl.BlockSpec((Hp, F), lambda i: (0, 0)),     # W: resident across batch tiles
            pl.BlockSpec((1, F), lambda i: (0, 0)),      # b: resident
        ],
        out_specs=pl.BlockSpec((TB, F), lambda i: (i, 0)),
        compiler_params=pltpu.CompilerParams(
            dimension_semantics=("parallel",),
            vmem_limit_bytes=vmem_limit_bytes,
        ),
    )(x, WT_pad, W_pad, b_row)


if __name__ == "__main__":
    feature_count = 5
    hidden_count = 2
    batch_size = 8

    key = jax.random.PRNGKey(0)
    k_w, k_x = jax.random.split(key)

    # Deterministic xavier_normal_-style init for W: std = sqrt(2 / (fan_in + fan_out))
    std = (2.0 / (hidden_count + feature_count)) ** 0.5
    W = jax.random.normal(k_w, (hidden_count, feature_count), dtype=jnp.float32) * std
    b = jnp.zeros((feature_count,), dtype=jnp.float32)

    # Inputs analogous to generate_batch (uniform [0,1), feature_probability=1 -> all present)
    x = jax.random.uniform(k_x, (batch_size, feature_count), dtype=jnp.float32)

    out = superposition_forward(x, W, b)
    out = jax.block_until_ready(out)

    # fp32 NumPy reference for the PyTorch forward: relu((x @ W.T) @ W + b)
    x_np, W_np, b_np = np.asarray(x), np.asarray(W), np.asarray(b)
    ref = np.maximum((x_np @ W_np.T) @ W_np + b_np, 0.0)
    assert out.shape == (batch_size, feature_count)
    assert np.allclose(np.asarray(out), ref, atol=1e-5, rtol=1e-5)

    print("KERNEL_OK")
</pallas_src>

<mosaic_0001>
module attributes {stable_mosaic.version = 11 : i64} {
  func.func @_superposition_kernel(%arg0: i32, %arg1: memref<8x5xf32, #tpu.memory_space<vmem>>, %arg2: memref<5x128xf32, #tpu.memory_space<vmem>>, %arg3: memref<128x5xf32, #tpu.memory_space<vmem>>, %arg4: memref<1x5xf32, #tpu.memory_space<vmem>>, %arg5: memref<8x5xf32, #tpu.memory_space<vmem>>) attributes {dimension_semantics = [#tpu.dimension_semantics<parallel>], iteration_bounds = array<i64: 1>, scalar_prefetch = 0 : i64, scratch_operands = 0 : i64, tpu.core_type = #tpu.core_type<tc>, window_params = [{transform_indices = @transform_0, window_bounds = array<i64: 8, 5>}, {pipeline_mode = #tpu.pipeline_mode<synchronous>, transform_indices = @transform_1, window_bounds = array<i64: 5, 128>}, {pipeline_mode = #tpu.pipeline_mode<synchronous>, transform_indices = @transform_2, window_bounds = array<i64: 128, 5>}, {pipeline_mode = #tpu.pipeline_mode<synchronous>, transform_indices = @transform_3, window_bounds = array<i64: 1, 5>}, {transform_indices = @transform_4, window_bounds = array<i64: 8, 5>}]} {
    %c0 = arith.constant 0 : index
    %c0_0 = arith.constant 0 : index
    %0 = vector.load %arg1[%c0, %c0_0] : memref<8x5xf32, #tpu.memory_space<vmem>>, vector<8x5xf32>
    %c0_1 = arith.constant 0 : index
    %c0_2 = arith.constant 0 : index
    %1 = vector.load %arg2[%c0_1, %c0_2] : memref<5x128xf32, #tpu.memory_space<vmem>>, vector<5x128xf32>
    %cst = arith.constant dense<0.000000e+00> : vector<8x128xf32>
    %2 = tpu.matmul %0, %1, %cst {dimension_numbers = #tpu.dot_dimension_numbers<[1], [0], [0], [1], [0, 0, 1, 1], [], []>, precision = #tpu.contract_precision<fp32>} : vector<8x5xf32>, vector<5x128xf32>, vector<8x128xf32> -> vector<8x128xf32>
    %c0_3 = arith.constant 0 : index
    %c0_4 = arith.constant 0 : index
    %3 = vector.load %arg3[%c0_3, %c0_4] : memref<128x5xf32, #tpu.memory_space<vmem>>, vector<128x5xf32>
    %cst_5 = arith.constant dense<0.000000e+00> : vector<8x5xf32>
    %4 = tpu.matmul %2, %3, %cst_5 {dimension_numbers = #tpu.dot_dimension_numbers<[1], [0], [0], [1], [0, 0, 1, 1], [], []>, precision = #tpu.contract_precision<fp32>} : vector<8x128xf32>, vector<128x5xf32>, vector<8x5xf32> -> vector<8x5xf32>
    %c0_6 = arith.constant 0 : index
    %c0_7 = arith.constant 0 : index
    %5 = vector.load %arg4[%c0_6, %c0_7] : memref<1x5xf32, #tpu.memory_space<vmem>>, vector<1x5xf32>
    %6 = vector.broadcast %5 : vector<1x5xf32> to vector<8x5xf32>
    %7 = arith.addf %4, %6 : vector<8x5xf32>
    %cst_8 = arith.constant 0.000000e+00 : f32
    %8 = vector.broadcast %cst_8 : f32 to vector<8x5xf32>
    %9 = arith.maximumf %7, %8 : vector<8x5xf32>
    %c0_9 = arith.constant 0 : index
    %c0_10 = arith.constant 0 : index
    %10 = vector.load %arg5[%c0_9, %c0_10] : memref<8x5xf32, #tpu.memory_space<vmem>>, vector<8x5xf32>
    tpu.vector_store %arg5[%c0_9, %c0_10], %9 {strides = array<i32>} : memref<8x5xf32, #tpu.memory_space<vmem>>, vector<8x5xf32>,
    return
  }
  func.func @transform_0(%arg0: i32) -> (i32, i32) {
    %c0_i32 = arith.constant 0 : i32
    %c0_i32_0 = arith.constant 0 : i32
    return %arg0, %c0_i32 : i32, i32
  }
  func.func @transform_1(%arg0: i32) -> (i32, i32) {
    %c0_i32 = arith.constant 0 : i32
    %c0_i32_0 = arith.constant 0 : i32
    %c0_i32_1 = arith.constant 0 : i32
    return %c0_i32, %c0_i32_0 : i32, i32
  }
  func.func @transform_2(%arg0: i32) -> (i32, i32) {
    %c0_i32 = arith.constant 0 : i32
    %c0_i32_0 = arith.constant 0 : i32
    %c0_i32_1 = arith.constant 0 : i32
    return %c0_i32, %c0_i32_0 : i32, i32
  }
  func.func @transform_3(%arg0: i32) -> (i32, i32) {
    %c0_i32 = arith.constant 0 : i32
    %c0_i32_0 = arith.constant 0 : i32
    %c0_i32_1 = arith.constant 0 : i32
    return %c0_i32, %c0_i32_0 : i32, i32
  }
  func.func @transform_4(%arg0: i32) -> (i32, i32) {
    %c0_i32 = arith.constant 0 : i32
    %c0_i32_0 = arith.constant 0 : i32
    return %arg0, %c0_i32 : i32, i32
  }
}

</mosaic_0001>

<bundles_post_ra>
// kernel: tpu_custom_call.1
= control target key start
LH: loop header
LB: loop body
LE: loop exit
PB: predicated region body
PF: predicated region fallthrough
CT: control target
= control target key end

     0   :  { %vm24_vm0 = vcmask 1044480   ;;  %v1534_v2 = vmov 0.0   ;;  %vm1535_vm1 = vmmov 0   ;;  %vm20_vm2 = vcmask 39936   ;;  %s2007_s0 = inlined_call_operand.vmem [shape: f32[8,5], index: 0, kind: input, shape index: {}]   ;;  %s2008_s1 = inlined_call_operand.vmem [shape: f32[5,128], index: 1, kind: input, shape index: {}]   ;;  %s2009_s2 = inlined_call_operand.vmem [shape: f32[128,5], index: 2, kind: input, shape index: {}]   ;;  %s2010_s3 = inlined_call_operand.vmem [shape: f32[1,5], index: 3, kind: input, shape index: {}]   ;;  %s2011_s4 = inlined_call_operand.hbm [shape: f32[8,5], index: 4, kind: output, shape index: {}]  }
   0x1   :  { %v19_v0 = vld [vmem:[%s2008_s1] sm:$0x1f]  ;;  %1269 = vmatprep.subr.mxu0 %v1534_v2  ;;  %1271 = vmatprep.mubr.msk.f32.mxu0 %vm1535_vm1, %v1534_v2  ;;  %v489_v4 = vld [vmem:[%s2009_s2 + $0x78] sm:$0xff]  ;;  %v488_v5 = vld [vmem:[%s2009_s2 + $0x70] sm:$0xff] }
   0x2   :  { %v18_v1 = vld [vmem:[%s2007_s0] sm:$0xff]  ;;  %v26_v3 = vsel %vm24_vm0, %v19_v0, 0  ;;  %1274 = vmatprep.subr.mxu1 %v1534_v2  ;;  %1276 = vmatprep.mubr.msk.f32.mxu1 %vm1535_vm1, %v1534_v2  ;;  %v1581_v8 = vand.u32 4294901760, %v489_v4  ;;  %v487_v10 = vld [vmem:[%s2009_s2 + $0x68] sm:$0xff]  ;;  %v1588_v12 = vand.u32 4294901760, %v488_v5 }
   0x3   :  { %v59_v6 = vand.u32 4294901760, %v26_v3  ;;  %v22_v7 = vsel %vm20_vm2, %v18_v1, 0 }
   0x4   :  { %v1583_v9 = vand.u32 4294901760, %v22_v7 }
   0x5   :  { %1270 = vmatpush3.msra.mxu0 %v59_v6  ;;  %v136_v11 = vsub.f32 %v26_v3, %v59_v6 }
   0x6   :  { %9 = vsyncpa [#allocation3], 0  ;;  %1279 = vmatprep.subr.mxu0 %v1534_v2  ;;  %v95_v13 = vsub.f32 %v22_v7, %v1583_v9  ;;  %v486_v14 = vld [vmem:[%s2009_s2 + $0x60] sm:$0xff]  ;;  %v1596_v16 = vsub.f32 %v489_v4, %v1581_v8  ;;  %v1598_v17 = vand.u32 4294901760, %v487_v10  ;;  %v485_v18 = vld [vmem:[%s2009_s2 + $0x58] sm:$0xff]  ;;  %v1604_v21 = vsub.f32 %v488_v5, %v1588_v12  ;;  %s1536_s22 = smov [#allocation2]  }
   0x7   :  { %v137_v15 = vand.u32 4294901760, %v136_v11  ;;  %v1606_v22 = vand.u32 4294901760, %v486_v14  ;;  %v1608_v24 = vand.u32 4294901760, %v485_v18  ;;  %v484_v25 = vld [vmem:[%s2009_s2 + $0x50] sm:$0xff]  ;;  %v483_v30 = vld [vmem:[%s2009_s2 + $0x48] sm:$0xff]  ;;  %v482_v35 = vld [vmem:[%s2009_s2 + $0x40] sm:$0xff] }
   0x8   :  { %v96_v19 = vand.u32 4294901760, %v95_v13  ;;  %v591_v27 = vand.u32 4294901760, %v1596_v16  ;;  %v1615_v28 = vsub.f32 %v487_v10, %v1598_v17  ;;  %v598_v31 = vand.u32 4294901760, %v1604_v21  ;;  %v481_v39 = vld [vmem:[%s2009_s2 + $0x38] sm:$0xff]  ;;  %s1146_s23 = sshll.u32 %s1536_s22, 4  ;;  %s1147_s23 = int_to_ptr.vmem [resolvable:$true] %s1146_s23 }
   0x9   :  { %v138_v20 = vsub.f32 %v136_v11, %v137_v15  ;;  %v1622_v32 = vsub.f32 %v486_v14, %v1606_v22  ;;  %v1624_v33 = vand.u32 4294901760, %v484_v25  ;;  %v1628_v34 = vsub.f32 %v485_v18, %v1608_v24  ;;  %s1512_s24 = scalar_lea.vmem %s1147_s23, 128  ;;  %p1517_p1 = scmp.lt.s32.totalorder %s1147_s23, %s1147_s23 }
   0xa   :  { %v97_v23 = vsub.f32 %v95_v13, %v96_v19  ;;  %v592_v36 = vsub.f32 %v1596_v16, %v591_v27  ;;  %v605_v37 = vand.u32 4294901760, %v1615_v28  ;;  %v1638_v38 = vand.u32 4294901760, %v483_v30  ;;  %p1513_p0 = scmp.ne.s32.totalorder %s1147_s23, %s1512_s24  ;;  %p1518_p2 = scmp.lt.s32.totalorder %s1512_s24, %s1512_s24 }
   0xb   :  { %v139_v26 = vand.u32 4294901760, %v138_v20  ;;  %v599_v40 = vsub.f32 %v1604_v21, %v598_v31  ;;  %v612_v41 = vand.u32 4294901760, %v1622_v32  ;;  %v1653_v42 = vsub.f32 %v484_v25, %v1624_v33 }
   0xc   :  { %v98_v29 = vand.u32 4294901760, %v97_v23  ;;  %v1655_v43 = vand.u32 4294901760, %v482_v35  ;;  %v619_v44 = vand.u32 4294901760, %v1628_v34  ;;  %v593_v45 = vand.u32 4294901760, %v592_v36  ;;  %p1519_p3 = por %p1518_p2, %p1517_p1 }
   0xd   :  { %1275 = vmatpush3.msra.mxu1 %v139_v26  ;;  %v606_v46 = vsub.f32 %v1615_v28, %v605_v37  ;;  %v1663_v47 = vsub.f32 %v483_v30, %v1638_v38  ;;  %v1665_v48 = vand.u32 4294901760, %v481_v39  ;;  %v600_v49 = vand.u32 4294901760, %v599_v40 }
   0xe   :  { %1272 = vmatmul.mubr.f32.vlgmr.msra.gmra.mxu0 %v98_v29  ;;  %1277 = vmatmul.mubr.f32.vlgmr.msra.gmra.mxu1 %v1583_v9  ;;  %v613_v50 = vsub.f32 %v1622_v32, %v612_v41  ;;  %v626_v51 = vand.u32 4294901760, %v1653_v42  ;;  %v1677_v52 = vsub.f32 %v482_v35, %v1655_v43  ;;  %v620_v54 = vsub.f32 %v1628_v34, %v619_v44  ;;  %v476_v29 = vld [vmem:[%s2009_s2 + $0x10] sm:$0xff]  ;;  %p1520_p4 = pnand %p1519_p3, %p1513_p0 }
   0xf   :  { %1280 = vmatpush3.msra.mxu0 %v136_v11  ;;  %1284 = vmatprep.subr.mxu1 %v1534_v2  ;;  %v607_v53 = vand.u32 4294901760, %v606_v46  ;;  %v633_v55 = vand.u32 4294901760, %v1663_v47  ;;  %v1687_v56 = vsub.f32 %v481_v39, %v1665_v48  ;;  %v1785_v40 = vand.u32 4294901760, %v476_v29 }
  0x10   :  { %1285 = vmatpush3.msra.mxu1 %v59_v6  ;;  %1281 = vmatprep.mubr.msk.f32.mxu0 %vm1535_vm1, %v1534_v2  ;;  %v614_v57 = vand.u32 4294901760, %v613_v50  ;;  %v627_v58 = vsub.f32 %v1653_v42, %v626_v51  ;;  %v640_v59 = vand.u32 4294901760, %v1677_v52  ;;  %v621_v60 = vand.u32 4294901760, %v620_v54 }
  0x11   :  { %1289 = vmatprep.subr.mxu0 %v1534_v2  ;;  %1286 = vmatprep.mubr.msk.f32.mxu1 %vm1535_vm1, %v1534_v2  ;;  %v634_v61 = vsub.f32 %v1663_v47, %v633_v55  ;;  %v647_v62 = vand.u32 4294901760, %v1687_v56  ;;  %v1799_v54 = vsub.f32 %v476_v29, %v1785_v40 }
  0x12   :  { %1282 = vmatmul.mubr.f32.vlgmr.msra.gmra.mxu0 %v95_v13  ;;  %1287 = vmatmul.mubr.f32.vlgmr.msra.gmra.mxu1 %v96_v19  ;;  %v628_v63 = vand.u32 4294901760, %v627_v58  ;;  %v641_v0 = vsub.f32 %v1677_v52, %v640_v59  ;;  %v478_v13 = vld [vmem:[%s2009_s2 + $0x20] sm:$0xff]  ;;  %v477_v19 = vld [vmem:[%s2009_s2 + $0x18] sm:$0xff] }
  0x13   :  { %1290 = vmatpush3.msra.mxu0 %v137_v15  ;;  %1294 = vmatprep.subr.mxu1 %v1534_v2  ;;  %v635_v1 = vand.u32 4294901760, %v634_v61  ;;  %v648_v3 = vsub.f32 %v1687_v56, %v647_v62  ;;  %v1756_v18 = vand.u32 4294901760, %v478_v13  ;;  %v1770_v26 = vand.u32 4294901760, %v477_v19 }
  0x14   :  { %1295 = vmatpush3.msra.mxu1 %v59_v6  ;;  %1291 = vmatprep.mubr.msk.f32.mxu0 %vm1535_vm1, %v1534_v2  ;;  %v642_v4 = vand.u32 4294901760, %v641_v0  ;;  %v480_v6 = vld [vmem:[%s2009_s2 + $0x30] sm:$0xff]  ;;  %v2014_v0 = vand.u32 4294901760, %v1799_v54 }
  0x15   :  { %1296 = vmatprep.mubr.msk.f32.mxu1 %vm1535_vm1, %v1534_v2  ;;  %1334 = vmatprep.subr.mxu1 %v1534_v2  ;;  %v649_v5 = vand.u32 4294901760, %v648_v3  ;;  %v1737_v7 = vand.u32 4294901760, %v480_v6  ;;  %v1768_v25 = vsub.f32 %v478_v13, %v1756_v18  ;;  %v1782_v39 = vsub.f32 %v477_v19, %v1770_v26 }
  0x16   :  { %1292 = vmatmul.mubr.f32.vlgmr.msra.gmra.mxu0 %v1583_v9  ;;  %1297 = vmatmul.mubr.f32.vlgmr.msra.gmra.mxu1 %v1583_v9  ;;  %v479_v9 = vld [vmem:[%s2009_s2 + $0x28] sm:$0xff] }
  0x17   :  { %1335 = vmatpush3.msra.mxu1 %v593_v45  ;;  %1299 = vmatprep.subr.mxu0 %v1534_v2  ;;  %v1743_v10 = vsub.f32 %v480_v6, %v1737_v7  ;;  %v1745_v11 = vand.u32 4294901760, %v479_v9  ;;  %v668_v36 = vand.u32 4294901760, %v1768_v25  ;;  %v475_v45 = vld [vmem:[%s2009_s2 + $0x8] sm:$0xff]  ;;  %v2015_v50 = vand.u32 4294901760, %v1782_v39 }
  0x18   :  { %1336 = vmatprep.subr.mxu1 %v1534_v2  ;;  %1300 = vmatpush3.msra.mxu0 %v1581_v8 }
  0x19   :  { %1337 = vmatpush3.msra.mxu1 %v600_v49  ;;  %1301 = vmatprep.subr.mxu0 %v1534_v2  ;;  %v654_v14 = vand.u32 4294901760, %v1743_v10  ;;  %v1754_v15 = vsub.f32 %v479_v9, %v1745_v11  ;;  %v669_v49 = vsub.f32 %v1768_v25, %v668_v36 }
  0x1a   :  { %1338 = vmatprep.subr.mxu1 %v1534_v2  ;;  %1302 = vmatpush3.msra.mxu0 %v1588_v12 }
  0x1b   :  { %1339 = vmatpush3.msra.mxu1 %v607_v53  ;;  %1303 = vmatprep.subr.mxu0 %v1534_v2  ;;  %v655_v20 = vsub.f32 %v1743_v10, %v654_v14  ;;  %v661_v23 = vand.u32 4294901760, %v1754_v15  ;;  %v1795_v53 = vand.u32 4294901760, %v475_v45  ;;  %v670_v58 = vand.u32 4294901760, %v669_v49 }
  0x1c   :  { %1340 = vmatprep.subr.mxu1 %v1534_v2  ;;  %1304 = vmatpush3.msra.mxu0 %v1598_v17 }
  0x1d   :  { %1341 = vmatpush3.msra.mxu1 %v614_v57  ;;  %1305 = vmatprep.subr.mxu0 %v1534_v2  ;;  %v656_v30 = vand.u32 4294901760, %v655_v20  ;;  %v662_v35 = vsub.f32 %v1754_v15, %v661_v23  ;;  %v474_v57 = vld [vmem:[%s2009_s2] sm:$0xff]  ;;  %v1809_v61 = vsub.f32 %v475_v45, %v1795_v53 }
  0x1e   :  { %1342 = vmatprep.subr.mxu1 %v1534_v2  ;;  %1306 = vmatpush3.msra.mxu0 %v1606_v22 }
  0x1f   :  { %1343 = vmatpush3.msra.mxu1 %v621_v60  ;;  %1307 = vmatprep.subr.mxu0 %v1534_v2  ;;  %v663_v46 = vand.u32 4294901760, %v662_v35  ;;  %v676_v60 = vsub.f32 %v1782_v39, %v2015_v50  ;;  %v2013_v3 = vand.u32 4294901760, %v1809_v61 }
  0x20   :  { %1344 = vmatprep.subr.mxu1 %v1534_v2  ;;  %1308 = vmatpush3.msra.mxu0 %v1608_v24 }
  0x21   :  { %1345 = vmatpush3.msra.mxu1 %v628_v63  ;;  %1309 = vmatprep.subr.mxu0 %v1534_v2  ;;  %v1811_v63 = vand.u32 4294901760, %v474_v57  ;;  %v690_v6 = vsub.f32 %v1809_v61, %v2013_v3 }
  0x22   :  { %1346 = vmatprep.subr.mxu1 %v1534_v2  ;;  %1310 = vmatpush3.msra.mxu0 %v1624_v33 }
  0x23   :  { %1347 = vmatpush3.msra.mxu1 %v635_v1  ;;  %1311 = vmatprep.subr.mxu0 %v1534_v2  ;;  %v677_v1 = vand.u32 4294901760, %v676_v60  ;;  %v691_v19 = vand.u32 4294901760, %v690_v6 }
  0x24   :  { %1348 = vmatprep.subr.mxu1 %v1534_v2  ;;  %1312 = vmatpush3.msra.mxu0 %v1638_v38 }
  0x25   :  { %1349 = vmatpush3.msra.mxu1 %v642_v4  ;;  %1313 = vmatprep.subr.mxu0 %v1534_v2  ;;  %v1819_v4 = vsub.f32 %v474_v57, %v1811_v63 }
  0x26   :  { %1350 = vmatprep.subr.mxu1 %v1534_v2  ;;  %1314 = vmatpush3.msra.mxu0 %v1655_v43 }
  0x27   :  { %1351 = vmatpush3.msra.mxu1 %v649_v5  ;;  %1315 = vmatprep.subr.mxu0 %v1534_v2  ;;  %v683_v5 = vsub.f32 %v1799_v54, %v2014_v0  ;;  %v2012_v9 = vand.u32 4294901760, %v1819_v4 }
  0x28   :  { %1352 = vmatprep.subr.mxu1 %v1534_v2  ;;  %1316 = vmatpush3.msra.mxu0 %v1665_v48 }
  0x29   :  { %1317 = vmatprep.subr.mxu0 %v1534_v2  ;;  %1366 = vmatprep.mubr.msk.f32.mxu1 %vm1535_vm1, %v1534_v2  ;;  %v684_v13 = vand.u32 4294901760, %v683_v5  ;;  %v697_v20 = vsub.f32 %v1819_v4, %v2012_v9 }
  0x2a   :  { %1331 = vmatprep.mubr.msk.f32.mxu0 %vm1535_vm1, %v1534_v2  ;;  %1318 = vmatpush3.msra.mxu0 %v1737_v7 }
  0x2b   :  { %1319 = vmatprep.subr.mxu0 %v1534_v2  ;;  %1353 = vmatpush3.msra.mxu1 %v656_v30  ;;  %v698_v29 = vand.u32 4294901760, %v697_v20 }
  0x2c   :  { %1320 = vmatpush3.msra.mxu0 %v1745_v11  ;;  %1354 = vmatprep.subr.mxu1 %v1534_v2 }
  0x2d   :  { %1321 = vmatprep.subr.mxu0 %v1534_v2  ;;  %1355 = vmatpush3.msra.mxu1 %v663_v46 }
  0x2e   :  { %1322 = vmatpush3.msra.mxu0 %v1756_v18  ;;  %1356 = vmatprep.subr.mxu1 %v1534_v2 }
  0x2f   :  { %1323 = vmatprep.subr.mxu0 %v1534_v2  ;;  %1357 = vmatpush3.msra.mxu1 %v670_v58 }
  0x30   :  { %1324 = vmatpush3.msra.mxu0 %v1770_v26  ;;  %1358 = vmatprep.subr.mxu1 %v1534_v2 }
  0x31   :  { %1325 = vmatprep.subr.mxu0 %v1534_v2  ;;  %1359 = vmatpush3.msra.mxu1 %v677_v1 }
  0x32   :  { %1326 = vmatpush3.msra.mxu0 %v1785_v40  ;;  %1360 = vmatprep.subr.mxu1 %v1534_v2 }
  0x33   :  { %1327 = vmatprep.subr.mxu0 %v1534_v2  ;;  %1361 = vmatpush3.msra.mxu1 %v684_v13 }
  0x34   :  { %1328 = vmatpush3.msra.mxu0 %v1795_v53  ;;  %1362 = vmatprep.subr.mxu1 %v1534_v2 }
  0x35   :  { %1329 = vmatprep.subr.mxu0 %v1534_v2  ;;  %1363 = vmatpush3.msra.mxu1 %v691_v19 }
  0x36   :  { %1330 = vmatpush3.msra.mxu0 %v1811_v63  ;;  %1364 = vmatprep.subr.mxu1 %v1534_v2 }
  0x37   :  { %1369 = vmatprep.subr.mxu0 %v1534_v2  ;;  %1365 = vmatpush3.msra.mxu1 %v698_v29 }
  0x38   :  { %1404 = vmatprep.subr.mxu1 %v1534_v2 }
  0xce   :  { %v100_v30 = vpop.f32.mrf.mxu0  ;;  %v176_v35 = vpop.f32.mrf.mxu1 }
  0xcf   :  { %v177_v45 = vadd.f32 %v176_v35, %v100_v30 }
  0xd0   :  { %v1273_v46 = vpop.f32.mrf.mxu0  ;;  %v1278_v49 = vpop.f32.mrf.mxu1 }
  0xd2   :  { %v250_v57 = vpop.f32.mrf.mxu0  ;;  %v324_v58 = vpop.f32.mrf.mxu1 }
  0xd3   :  { %v251_v60 = vadd.f32 %v250_v57, %v177_v45 }
  0xd4   :  { %v1283_v1 = vpop.f32.mrf.mxu0  ;;  %v1288_v5 = vpop.f32.mrf.mxu1 }
  0xd5   :  { %v325_v6 = vadd.f32 %v324_v58, %v251_v60 }
  0xd6   :  { %v398_v13 = vpop.f32.mrf.mxu0  ;;  %v470_v9 = vpop.f32.mrf.mxu1 }
  0xd7   :  { %v399_v20 = vadd.f32 %v398_v13, %v325_v6 }
  0xd8   :  { %v1293_v19 = vpop.f32.mrf.mxu0  ;;  %v1298_v3 = vpop.f32.mrf.mxu1 }
  0xd9   :  { %v471_v0 = vadd.f32 %v470_v9, %v399_v20 }
  0xdb   :  { %v1839_v29 = vand.u32 4294901760, %v471_v0 }
  0xdd   :  { %v1842_v50 = vsub.f32 %v471_v0, %v1839_v29  ;;  %1367 = vmatmul.mubr.f32.vlgmr.msra.gmra.mxu1 %v1839_v29 }
  0xde   :  { %1405 = vmatpush3.msra.mxu1 %v1581_v8  ;;  %1436 = vmatprep.mubr.msk.f32.mxu1 %vm1535_vm1, %v1534_v2 }
  0xdf   :  { %v580_v30 = vand.u32 4294901760, %v1842_v50  ;;  %1406 = vmatprep.subr.mxu1 %v1534_v2 }
  0xe0   :  { %1407 = vmatpush3.msra.mxu1 %v1588_v12 }
  0xe1   :  { %v581_v3 = vsub.f32 %v1842_v50, %v580_v30  ;;  %1408 = vmatprep.subr.mxu1 %v1534_v2 }
  0xe2   :  { %1409 = vmatpush3.msra.mxu1 %v1598_v17 }
  0xe3   :  { %1410 = vmatprep.subr.mxu1 %v1534_v2  ;;  %v582_v0 = vand.u32 4294901760, %v581_v3 }
  0xe4   :  { %1411 = vmatpush3.msra.mxu1 %v1606_v22 }
  0xe5   :  { %1412 = vmatprep.subr.mxu1 %v1534_v2  ;;  %1332 = vmatmul.mubr.f32.vlgmr.msra.gmra.mxu0 %v582_v0 }
  0xe6   :  { %1370 = vmatpush3.msra.mxu0 %v1596_v16  ;;  %1413 = vmatpush3.msra.mxu1 %v1608_v24  ;;  %v2018_v16 = vand.u32 4294901760, %v1809_v61 }
  0xe7   :  { %1371 = vmatprep.subr.mxu0 %v1534_v2  ;;  %1414 = vmatprep.subr.mxu1 %v1534_v2 }
  0xe8   :  { %1372 = vmatpush3.msra.mxu0 %v1604_v21  ;;  %1415 = vmatpush3.msra.mxu1 %v1624_v33 }
  0xe9   :  { %1373 = vmatprep.subr.mxu0 %v1534_v2  ;;  %1416 = vmatprep.subr.mxu1 %v1534_v2 }
  0xea   :  { %1374 = vmatpush3.msra.mxu0 %v1615_v28  ;;  %1417 = vmatpush3.msra.mxu1 %v1638_v38 }
  0xeb   :  { %1375 = vmatprep.subr.mxu0 %v1534_v2  ;;  %1418 = vmatprep.subr.mxu1 %v1534_v2 }
  0xec   :  { %1376 = vmatpush3.msra.mxu0 %v1622_v32  ;;  %1419 = vmatpush3.msra.mxu1 %v1655_v43 }
  0xed   :  { %1377 = vmatprep.subr.mxu0 %v1534_v2  ;;  %1420 = vmatprep.subr.mxu1 %v1534_v2 }
  0xee   :  { %1378 = vmatpush3.msra.mxu0 %v1628_v34  ;;  %1421 = vmatpush3.msra.mxu1 %v1665_v48  ;;  %v1154_v34 = vld [vmem:[%s2010_s3] ss:$0 sm:$0xff] }
  0xef   :  { %1379 = vmatprep.subr.mxu0 %v1534_v2  ;;  %1422 = vmatprep.subr.mxu1 %v1534_v2 }
  0xf0   :  { %1380 = vmatpush3.msra.mxu0 %v1653_v42  ;;  %1423 = vmatpush3.msra.mxu1 %v1737_v7 }
  0xf1   :  { %1381 = vmatprep.subr.mxu0 %v1534_v2  ;;  %1424 = vmatprep.subr.mxu1 %v1534_v2 }
  0xf2   :  { %1382 = vmatpush3.msra.mxu0 %v1663_v47  ;;  %1425 = vmatpush3.msra.mxu1 %v1745_v11 }
  0xf3   :  { %1383 = vmatprep.subr.mxu0 %v1534_v2  ;;  %1426 = vmatprep.subr.mxu1 %v1534_v2 }
  0xf4   :  { %1384 = vmatpush3.msra.mxu0 %v1677_v52  ;;  %1427 = vmatpush3.msra.mxu1 %v1756_v18 }
  0xf5   :  { %1385 = vmatprep.subr.mxu0 %v1534_v2  ;;  %1428 = vmatprep.subr.mxu1 %v1534_v2 }
  0xf6   :  { %1386 = vmatpush3.msra.mxu0 %v1687_v56  ;;  %1429 = vmatpush3.msra.mxu1 %v1770_v26 }
  0xf7   :  { %1387 = vmatprep.subr.mxu0 %v1534_v2  ;;  %1430 = vmatprep.subr.mxu1 %v1534_v2 }
  0xf8   :  { %1388 = vmatpush3.msra.mxu0 %v1743_v10  ;;  %1431 = vmatpush3.msra.mxu1 %v1785_v40 }
  0xf9   :  { %1389 = vmatprep.subr.mxu0 %v1534_v2  ;;  %1432 = vmatprep.subr.mxu1 %v1534_v2 }
  0xfa   :  { %1390 = vmatpush3.msra.mxu0 %v1754_v15  ;;  %1433 = vmatpush3.msra.mxu1 %v1795_v53 }
  0xfb   :  { %1391 = vmatprep.subr.mxu0 %v1534_v2  ;;  %1434 = vmatprep.subr.mxu1 %v1534_v2 }
  0xfc   :  { %1392 = vmatpush3.msra.mxu0 %v1768_v25  ;;  %1435 = vmatpush3.msra.mxu1 %v1811_v63 }
  0xfd   :  { %1393 = vmatprep.subr.mxu0 %v1534_v2  ;;  %1437 = vmatmul.mubr.f32.vlgmr.msra.gmra.mxu1 %v580_v30 }
  0xfe   :  { %1474 = vmatprep.subr.mxu1 %v1534_v2  ;;  %1394 = vmatpush3.msra.mxu0 %v1782_v39 }
  0xff   :  { %1475 = vmatpush3.msra.mxu1 %v1581_v8  ;;  %1395 = vmatprep.subr.mxu0 %v1534_v2  ;;  %v2016_v8 = vand.u32 4294901760, %v1782_v39 }
 0x100   :  { %1476 = vmatprep.subr.mxu1 %v1534_v2  ;;  %1396 = vmatpush3.msra.mxu0 %v1799_v54 }
 0x101   :  { %1477 = vmatpush3.msra.mxu1 %v1588_v12  ;;  %1397 = vmatprep.subr.mxu0 %v1534_v2  ;;  %v2017_v12 = vand.u32 4294901760, %v1799_v54 }
 0x102   :  { %1478 = vmatprep.subr.mxu1 %v1534_v2  ;;  %1398 = vmatpush3.msra.mxu0 %v1809_v61 }
 0x103   :  { %1479 = vmatpush3.msra.mxu1 %v1598_v17  ;;  %1399 = vmatprep.subr.mxu0 %v1534_v2  ;;  %v2019_v17 = vand.u32 4294901760, %v1819_v4 }
 0x104   :  { %1480 = vmatprep.subr.mxu1 %v1534_v2  ;;  %1400 = vmatpush3.msra.mxu0 %v1819_v4 }
 0x105   :  { %1401 = vmatprep.mubr.msk.f32.mxu0 %vm1535_vm1, %v1534_v2  ;;  %1481 = vmatpush3.msra.mxu1 %v1606_v22 }
 0x106   :  { %1402 = vmatmul.mubr.f32.vlgmr.msra.gmra.mxu0 %v1842_v50  ;;  %1439 = vmatprep.subr.mxu0 %v1534_v2 }
 0x107   :  { %1482 = vmatprep.subr.mxu1 %v1534_v2  ;;  %1440 = vmatpush3.msra.mxu0 %v591_v27 }
 0x108   :  { %1483 = vmatpush3.msra.mxu1 %v1608_v24  ;;  %1441 = vmatprep.subr.mxu0 %v1534_v2 }
 0x109   :  { %1484 = vmatprep.subr.mxu1 %v1534_v2  ;;  %1442 = vmatpush3.msra.mxu0 %v598_v31 }
 0x10a   :  { %1485 = vmatpush3.msra.mxu1 %v1624_v33  ;;  %1443 = vmatprep.subr.mxu0 %v1534_v2 }
 0x10b   :  { %1486 = vmatprep.subr.mxu1 %v1534_v2  ;;  %1444 = vmatpush3.msra.mxu0 %v605_v37 }
 0x10c   :  { %1487 = vmatpush3.msra.mxu1 %v1638_v38  ;;  %1445 = vmatprep.subr.mxu0 %v1534_v2 }
 0x10d   :  { %1488 = vmatprep.subr.mxu1 %v1534_v2  ;;  %1446 = vmatpush3.msra.mxu0 %v612_v41 }
 0x10e   :  { %1489 = vmatpush3.msra.mxu1 %v1655_v43  ;;  %1447 = vmatprep.subr.mxu0 %v1534_v2 }
 0x10f   :  { %1490 = vmatprep.subr.mxu1 %v1534_v2  ;;  %1448 = vmatpush3.msra.mxu0 %v619_v44 }
 0x110   :  { %1491 = vmatpush3.msra.mxu1 %v1665_v48  ;;  %1449 = vmatprep.subr.mxu0 %v1534_v2 }
 0x111   :  { %1492 = vmatprep.subr.mxu1 %v1534_v2  ;;  %1450 = vmatpush3.msra.mxu0 %v626_v51 }
 0x112   :  { %1493 = vmatpush3.msra.mxu1 %v1737_v7  ;;  %1451 = vmatprep.subr.mxu0 %v1534_v2 }
 0x113   :  { %1494 = vmatprep.subr.mxu1 %v1534_v2  ;;  %1452 = vmatpush3.msra.mxu0 %v633_v55 }
 0x114   :  { %1495 = vmatpush3.msra.mxu1 %v1745_v11  ;;  %1453 = vmatprep.subr.mxu0 %v1534_v2 }
 0x115   :  { %1496 = vmatprep.subr.mxu1 %v1534_v2  ;;  %1454 = vmatpush3.msra.mxu0 %v640_v59 }
 0x116   :  { %1497 = vmatpush3.msra.mxu1 %v1756_v18  ;;  %1455 = vmatprep.subr.mxu0 %v1534_v2 }
 0x117   :  { %1498 = vmatprep.subr.mxu1 %v1534_v2  ;;  %1456 = vmatpush3.msra.mxu0 %v647_v62 }
 0x118   :  { %1499 = vmatpush3.msra.mxu1 %v1770_v26  ;;  %1457 = vmatprep.subr.mxu0 %v1534_v2 }
 0x119   :  { %1500 = vmatprep.subr.mxu1 %v1534_v2  ;;  %1458 = vmatpush3.msra.mxu0 %v654_v14 }
 0x11a   :  { %1501 = vmatpush3.msra.mxu1 %v1785_v40  ;;  %1459 = vmatprep.subr.mxu0 %v1534_v2 }
 0x11b   :  { %1502 = vmatprep.subr.mxu1 %v1534_v2  ;;  %1460 = vmatpush3.msra.mxu0 %v661_v23 }
 0x11c   :  { %1503 = vmatpush3.msra.mxu1 %v1795_v53  ;;  %1461 = vmatprep.subr.mxu0 %v1534_v2 }
 0x11d   :  { %1504 = vmatprep.subr.mxu1 %v1534_v2  ;;  %1462 = vmatpush3.msra.mxu0 %v668_v36 }
 0x11e   :  { %1505 = vmatpush3.msra.mxu1 %v1811_v63  ;;  %1506 = vmatprep.mubr.msk.f32.mxu1 %vm1535_vm1, %v1534_v2 }
 0x11f   :  { %1463 = vmatprep.subr.mxu0 %v1534_v2  ;;  %1507 = vmatmul.mubr.f32.vlgmr.msra.gmra.mxu1 %v1839_v29 }
 0x120   :  { %1464 = vmatpush3.msra.mxu0 %v2016_v8  ;;  %1471 = vmatprep.mubr.msk.f32.mxu0 %vm1535_vm1, %v1534_v2 }
 0x121   :  { %1465 = vmatprep.subr.mxu0 %v1534_v2 }
 0x122   :  { %1466 = vmatpush3.msra.mxu0 %v2017_v12 }
 0x123   :  { %1467 = vmatprep.subr.mxu0 %v1534_v2 }
 0x124   :  { %1468 = vmatpush3.msra.mxu0 %v2018_v16 }
 0x125   :  { %1469 = vmatprep.subr.mxu0 %v1534_v2 }
 0x126   :  { %1470 = vmatpush3.msra.mxu0 %v2019_v17 }
 0x127   :  { %1472 = vmatmul.mubr.f32.vlgmr.msra.gmra.mxu0 %v1839_v29 }
 0x19d   :  { %v735_v21 = vpop.f32.mrf.mxu1 }
 0x19f   :  { %v1368_v22 = vpop.f32.mrf.mxu1 }
 0x1a5   :  { %v584_v24 = vpop.f32.mrf.mxu0 }
 0x1a6   :  { %v585_v37 = vadd.f32 %v1154_v34, %v584_v24 }
 0x1a7   :  { %v1333_v27 = vpop.f32.mrf.mxu0 }
 0x1a8   :  { %v736_v2 = vadd.f32 %v735_v21, %v585_v37 }
 0x1bd   :  { %v928_v28 = vpop.f32.mrf.mxu1 }
 0x1bf   :  { %v1438_v31 = vpop.f32.mrf.mxu1 }
 0x1c6   :  { %v839_v32 = vpop.f32.mrf.mxu0 }
 0x1c7   :  { %v840_v42 = vadd.f32 %v839_v32, %v736_v2 }
 0x1c8   :  { %v1403_v33 = vpop.f32.mrf.mxu0 }
 0x1c9   :  { %v929_v43 = vadd.f32 %v928_v28, %v840_v42 }
 0x1df   :  { %v1134_v38 = vpop.f32.mrf.mxu1 }
 0x1e1   :  { %v1508_v41 = vpop.f32.mrf.mxu1 }
 0x1e7   :  { %v1047_v44 = vpop.f32.mrf.mxu0 }
 0x1e8   :  { %v1048_v47 = vadd.f32 %v1047_v44, %v929_v43 }
 0x1e9   :  { %v1473_v48 = vpop.f32.mrf.mxu0 }
 0x1ea   :  { %v1135_v51 = vadd.f32 %v1134_v38, %v1048_v47 }
 0x1ec   :  { %v1138_v52 = vmax.f32 %v1135_v51, 0.0 }
 0x1ee   :  { %1139 = vst.msk [vmem:[#allocation2] sm:$0xff] %vm20_vm2, %v1138_v52 }
 0x1ef   :  { %1523 = shalt.err (!%p1520_p4)
}
 0x1f0   :  { %1149 = dma.vmem_to_hbm [thread:$0]  %s1147_s23, 128, %s2011_s4, [#allocation3]  }
 0x1f1   :  { %1532 = dma.done.wait [#allocation3], 128  }
 0x1f2   :  { %1533 = vsyncadd [#allocation3], 4294967168 }
 0x1f3   :  { %1153 = vsyncpa [#allocation3], 1 }

</bundles_post_ra>
